<compile_context>
chip_gen: v5e
topology: v5e:2x2
jax: 0.10.0
libtpu: 0.0.40
codegen_flags: <defaults>
</compile_context>

<pallas_src>
import math

import numpy as np
import jax
import jax.numpy as jnp
from jax.experimental import pallas as pl
from jax.experimental.pallas import tpu as pltpu


# ---------------------------------------------------------------------------
# Parameter init (matches PatchBlurringModule.__init__):
#   self.blurring_factor = nn.Parameter(torch.tensor([1.0]))
# ---------------------------------------------------------------------------
BLURRING_FACTOR_PARAM = jnp.array([1.0], dtype=jnp.float32)

_LANE = 128
_SUBLANE = 8
_MIN_GRID_STEPS = 6       # >= ~3 pipeline steps per TensorCore (v7x has 2 TCs)
_M_ROWS_TARGET = 512      # target MXU M rows (and block-diag K) per grid step
_KRON_MAX_HW = 1024       # flat/Kronecker path only for small patches


def _round_up(x: int, m: int) -> int:
    return -(-x // m) * m


def _vmem_capacity_bytes() -> int:
    try:
        return int(pltpu.get_tpu_info().vmem_capacity_bytes)
    except Exception:
        return 64 * 2**20          # conservative (v7x-sized) fallback


def _vmem_budget_bytes() -> int:
    # ~70% of physical VMEM: ~90 MiB on v5e/v6e (128 MiB), ~45 MiB on v7x (64 MiB).
    return int(_vmem_capacity_bytes() * 0.70)


def _vmem_limit_bytes(vmem_need: int) -> int:
    cap = _vmem_capacity_bytes()
    return int(min(int(cap * 0.90), max(32 * 2**20, vmem_need + (8 << 20))))


def _compute_dtypes(x_dtype):
    """(matmul-operand dtype, intermediate dtype): bf16 stays bf16 end to end
    (with f32 MXU accumulation); everything else computes in f32."""
    if jnp.dtype(x_dtype) == jnp.dtype(jnp.bfloat16):
        return jnp.bfloat16, jnp.bfloat16
    return jnp.float32, jnp.float32


def _interp_matrix(out_size: int, in_size: int, scale: float) -> np.ndarray:
    """Row-sparse bilinear interpolation matrix (out_size, in_size).

    Matches PyTorch upsample_bilinear2d with align_corners=False and scale_factor
    given (recompute_scale_factor not set):
        src = max(scale * (dst + 0.5) - 0.5, 0),  scale = 1 / scale_factor.
    """
    dst = np.arange(out_size, dtype=np.float64)
    src = np.maximum(scale * (dst + 0.5) - 0.5, 0.0)
    i0 = np.minimum(np.floor(src).astype(np.int64), in_size - 1)
    i1 = np.minimum(i0 + 1, in_size - 1)
    w1 = np.clip(src - i0, 0.0, 1.0).astype(np.float32)
    w0 = (1.0 - w1).astype(np.float32)
    m = np.zeros((out_size, in_size), dtype=np.float32)
    rows = np.arange(out_size)
    m[rows, i0] += w0
    m[rows, i1] += w1
    return m


def _choose_tp(nc: int, align: int, tp_cap: int, min_steps: int) -> int:
    """Planes per grid step: a multiple of `align`, <= tp_cap, preferring
    (a) TP | NC (no plane padding, no post-kernel slice),
    (b) >= min_steps grid steps (pipeline depth) when NC allows,
    (c) the largest TP (bigger matmuls, fewer per-step overheads)."""
    hi = min((tp_cap // align) * align, _round_up(nc, align))
    hi = max(align, hi)
    attainable_steps = min(min_steps, -(-nc // align))
    best, best_key = align, None
    for tp in range(align, hi + 1, align):
        steps = -(-nc // tp)
        key = (steps * tp == nc, steps >= attainable_steps, tp)
        if best_key is None or key > best_key:
            best, best_key = tp, key
    return best


# ---------------------------------------------------------------------------
# Kernels
# ---------------------------------------------------------------------------
def _flat_resize_kernel(kT_ref, x_ref, o_ref):
    # One lane-dense MXU matmul per step:
    #   out_flat (TP, HWop) = x_flat (TP, H*W) @ (Wy (x) Wx)^T (H*W, HWop)
    o_ref[...] = jnp.dot(x_ref[...], kT_ref[...],
                         preferred_element_type=jnp.float32).astype(o_ref.dtype)


def _separable_resize_kernel(wyb_ref, wxT_ref, x_ref, o_ref, tmp_ref):
    # W-resize: one big-M MXU matmul over all TP planes (stacked rows).
    tmp_ref[...] = jnp.dot(x_ref[...], wxT_ref[...],
                           preferred_element_type=jnp.float32).astype(tmp_ref.dtype)
    # H-resize for all TP planes at once with block-diagonal kron(I_TP, Wy):
    # K = TP*H fills the MXU instead of TP tiny K=H dots.
    o_ref[...] = jnp.dot(wyb_ref[...], tmp_ref[...],
                         preferred_element_type=jnp.float32).astype(o_ref.dtype)


# ---------------------------------------------------------------------------
# Path wrappers
# ---------------------------------------------------------------------------
def _resize_flat(x, wy_np, wx_np):
    """Small-patch path: planes as lane-dense (NC, H*W) rows, one Kronecker matmul."""
    N, C, H, W = x.shape
    H_out, W_out = wy_np.shape[0], wx_np.shape[0]
    NC = N * C
    HW, HWo = H * W, H_out * W_out
    HWop = _round_up(HWo, _LANE)                   # lane-dense, unmasked stores
    wdtype, _ = _compute_dtypes(x.dtype)
    itemsize = int(jnp.dtype(x.dtype).itemsize)
    w_itemsize = int(jnp.dtype(wdtype).itemsize)

    kT_np = np.zeros((HW, HWop), dtype=np.float32)
    kT_np[:, :HWo] = np.kron(wy_np, wx_np).T       # (H*W, H_out*W_out), zero-padded lanes
    kT = jnp.asarray(kT_np, dtype=wdtype)

    # Padded-layout-aware VMEM accounting (double-buffered in/out blocks + resident kT,
    # conservatively counted twice as Pallas reserves two buffers per input).
    per_plane = 2 * _round_up(HW, _LANE) * itemsize + 2 * HWop * itemsize
    fixed = 2 * _round_up(HW, _SUBLANE) * HWop * w_itemsize
    budget = _vmem_budget_bytes()

    align = _SUBLANE                               # TP is the sublane dim of in/out blocks
    tp_hi = max(align, min(_M_ROWS_TARGET, _round_up(NC, align)))
    while tp_hi > align and fixed + tp_hi * per_plane > budget:
        tp_hi -= align
    TP = _choose_tp(NC, align, tp_hi, _MIN_GRID_STEPS)
    NCp = _round_up(NC, TP)

    x_flat = x.reshape(NC, HW)
    if NCp != NC:
        x_flat = jnp.pad(x_flat, ((0, NCp - NC), (0, 0)))

    vmem_need = fixed + TP * per_plane
    out = pl.pallas_call(
        _flat_resize_kernel,
        out_shape=jax.ShapeDtypeStruct((NCp, HWop), x.dtype),
        grid_spec=pltpu.PrefetchScalarGridSpec(
            num_scalar_prefetch=0,
            grid=(NCp // TP,),
            in_specs=[
                pl.BlockSpec((HW, HWop), lambda i: (0, 0)),    # (Wy (x) Wx)^T, resident
                pl.BlockSpec((TP, HW), lambda i: (i, 0)),      # TP lane-dense plane rows
            ],
            out_specs=pl.BlockSpec((TP, HWop), lambda i: (i, 0)),
        ),
        compiler_params=pltpu.CompilerParams(
            dimension_semantics=("parallel",),
            vmem_limit_bytes=_vmem_limit_bytes(vmem_need),
        ),
    )(kT, x_flat)

    if NCp != NC or HWop != HWo:
        out = out[:NC, :HWo]
    return out.reshape(N, C, H_out, W_out)


def _resize_separable(x, wy_np, wx_np):
    """General path: W-resize as one big-M matmul, H-resize as one block-diagonal
    matmul; row-stacked 2-D output (sublane- and lane-dense stores)."""
    N, C, H, W = x.shape
    H_out, W_out = wy_np.shape[0], wx_np.shape[0]
    NC = N * C
    Wp = _round_up(W_out, _LANE)                   # lane-dense, unmasked stores
    wdtype, tmp_dtype = _compute_dtypes(x.dtype)
    itemsize = int(jnp.dtype(x.dtype).itemsize)
    w_itemsize = int(jnp.dtype(wdtype).itemsize)
    tmp_itemsize = int(jnp.dtype(tmp_dtype).itemsize)

    # Sublane alignment so both the (TP*H, W) input block and the (TP*H_out, Wp)
    # output block have row counts that are multiples of 8.
    align = math.lcm(_SUBLANE // math.gcd(H, _SUBLANE),
                     _SUBLANE // math.gcd(H_out, _SUBLANE))

    Wl = _round_up(W, _LANE)
    budget = _vmem_budget_bytes()

    def vmem_need(tp):
        rows_in, rows_out = tp * H, tp * H_out
        return (2 * _round_up(rows_in, _SUBLANE) * Wl * itemsize                 # x block
                + 2 * _round_up(rows_out, _SUBLANE) * Wp * itemsize              # out block
                + _round_up(rows_in, _SUBLANE) * Wp * tmp_itemsize               # scratch
                + 2 * _round_up(rows_out, _SUBLANE) * _round_up(rows_in, _LANE) * w_itemsize  # kron(I, Wy)
                + 2 * _round_up(W, _SUBLANE) * Wp * w_itemsize)                  # Wx^T

    tp_hi = max(align, (max(1, _M_ROWS_TARGET // H) // align) * align)
    tp_hi = max(align, min(tp_hi, _round_up(NC, align)))
    while tp_hi > align and vmem_need(tp_hi) > budget:
        tp_hi -= align
    TP = _choose_tp(NC, align, tp_hi, _MIN_GRID_STEPS)
    NCp = _round_up(NC, TP)

    wy_big = jnp.asarray(np.kron(np.eye(TP, dtype=np.float32), wy_np), dtype=wdtype)
    wxT_np = np.zeros((W, Wp), dtype=np.float32)
    wxT_np[:, :W_out] = wx_np.T
    wxT = jnp.asarray(wxT_np, dtype=wdtype)

    x_flat = x.reshape(NC, H, W)
    if NCp != NC:
        x_flat = jnp.pad(x_flat, ((0, NCp - NC), (0, 0), (0, 0)))
    x2 = x_flat.reshape(NCp * H, W)

    out = pl.pallas_call(
        _separable_resize_kernel,
        out_shape=jax.ShapeDtypeStruct((NCp * H_out, Wp), x.dtype),
        grid_spec=pltpu.PrefetchScalarGridSpec(
            num_scalar_prefetch=0,
            grid=(NCp // TP,),
            in_specs=[
                pl.BlockSpec((TP * H_out, TP * H), lambda i: (0, 0)),  # kron(I_TP, Wy)
                pl.BlockSpec((W, Wp), lambda i: (0, 0)),               # Wx^T (lane-padded)
                pl.BlockSpec((TP * H, W), lambda i: (i, 0)),           # TP stacked planes
            ],
            out_specs=pl.BlockSpec((TP * H_out, Wp), lambda i: (i, 0)),
            scratch_shapes=[pltpu.VMEM((TP * H, Wp), tmp_dtype)],
        ),
        compiler_params=pltpu.CompilerParams(
            dimension_semantics=("parallel",),
            vmem_limit_bytes=_vmem_limit_bytes(vmem_need(TP)),
        ),
    )(wy_big, wxT, x2)

    out = out.reshape(NCp, H_out, Wp)
    if NCp != NC or Wp != W_out:
        out = out[:NC, :, :W_out]
    return out.reshape(N, C, H_out, W_out)


# ---------------------------------------------------------------------------
# Forward
# ---------------------------------------------------------------------------
def patch_blurring_forward(x: jnp.ndarray,
                           blurring_factor: jnp.ndarray = BLURRING_FACTOR_PARAM) -> jnp.ndarray:
    """Equivalent of PatchBlurringModule.forward for NCHW input x."""
    # torch.clamp(...).item(): host-side scalar pull; the output shape depends on it
    # in PyTorch too, so this cannot stay on-device.
    factor = float(jnp.clip(blurring_factor, 0.1, 1.0)[0])

    if x.ndim != 4:
        raise ValueError("expected NCHW input")
    if jnp.dtype(x.dtype) not in (jnp.dtype(jnp.float32), jnp.dtype(jnp.bfloat16)):
        x = x.astype(jnp.float32)

    N, C, H, W = x.shape
    H_out = max(1, int(math.floor(H * factor)))
    W_out = max(1, int(math.floor(W * factor)))

    # Identity factor (the default parameter value 1.0): bilinear resize with
    # align_corners=False and scale 1 reproduces the input exactly -> no kernel
    # launch, no HBM round trip.
    if H_out == H and W_out == W:
        return x

    scale = 1.0 / factor                # PyTorch uses 1/scale_factor internally
    wy_np = _interp_matrix(H_out, H, scale)        # (H_out, H)
    wx_np = _interp_matrix(W_out, W, scale)        # (W_out, W)

    # Small patches with a narrow minor dim: feed lane-dense (NC, H*W) rows and
    # resize with one Kronecker matmul (avoids the up-to-8x lane-padding waste of
    # a (rows, W<128) layout).  Larger images take the separable path.
    if W < _LANE and H * W <= _KRON_MAX_HW:
        return _resize_flat(x, wy_np, wx_np)
    return _resize_separable(x, wy_np, wx_np)


if __name__ == "__main__":
    key = jax.random.PRNGKey(0)
    x = jax.random.normal(key, (2, 4, 16, 16), dtype=jnp.float32)   # NCHW patches

    # 1) Default parameter (1.0) -> clamp -> identity resize (short-circuited).
    out_id = patch_blurring_forward(x, BLURRING_FACTOR_PARAM)
    jax.block_until_ready(out_id)
    assert out_id.shape == x.shape
    np.testing.assert_allclose(np.asarray(out_id), np.asarray(x), rtol=1e-6, atol=1e-6)

    # 2) Downsample (factor 0.5) through the flat/Kronecker kernel (W < 128),
    #    checked against the separable-bilinear reference computed on host.
    out_half = patch_blurring_forward(x, jnp.array([0.5], dtype=jnp.float32))
    jax.block_until_ready(out_half)
    assert out_half.shape == (2, 4, 8, 8)
    wy_ref = _interp_matrix(8, 16, 2.0)
    wx_ref = _interp_matrix(8, 16, 2.0)
    ref = np.einsum('oh,phw,vw->pov', wy_ref, np.asarray(x).reshape(8, 16, 16), wx_ref)
    np.testing.assert_allclose(np.asarray(out_half).reshape(8, 8, 8), ref,
                               rtol=1e-4, atol=1e-4)

    # 3) Larger image (W >= 128) through the separable big-matmul kernel.
    x2 = jax.random.normal(jax.random.PRNGKey(1), (1, 2, 48, 200), dtype=jnp.float32)
    out2 = patch_blurring_forward(x2, jnp.array([0.5], dtype=jnp.float32))
    jax.block_until_ready(out2)
    assert out2.shape == (1, 2, 24, 100)
    wy2 = _interp_matrix(24, 48, 2.0)
    wx2 = _interp_matrix(100, 200, 2.0)
    ref2 = np.einsum('oh,phw,vw->pov', wy2, np.asarray(x2).reshape(2, 48, 200), wx2)
    np.testing.assert_allclose(np.asarray(out2).reshape(2, 24, 100), ref2,
                               rtol=1e-4, atol=1e-4)

    print("KERNEL_OK")
</pallas_src>

<mosaic_0001>
module attributes {stable_mosaic.version = 11 : i64} {
  func.func @_flat_resize_kernel(%arg0: i32, %arg1: memref<256x128xf32, #tpu.memory_space<vmem>>, %arg2: memref<8x256xf32, #tpu.memory_space<vmem>>, %arg3: memref<8x128xf32, #tpu.memory_space<vmem>>) attributes {dimension_semantics = [#tpu.dimension_semantics<parallel>], iteration_bounds = array<i64: 1>, scalar_prefetch = 0 : i64, scratch_operands = 0 : i64, tpu.core_type = #tpu.core_type<tc>, window_params = [{pipeline_mode = #tpu.pipeline_mode<synchronous>, transform_indices = @transform_0, window_bounds = array<i64: 256, 128>}, {transform_indices = @transform_1, window_bounds = array<i64: 8, 256>}, {transform_indices = @transform_2, window_bounds = array<i64: 8, 128>}]} {
    %c0 = arith.constant 0 : index
    %c0_0 = arith.constant 0 : index
    %0 = vector.load %arg2[%c0, %c0_0] : memref<8x256xf32, #tpu.memory_space<vmem>>, vector<8x256xf32>
    %c0_1 = arith.constant 0 : index
    %c0_2 = arith.constant 0 : index
    %1 = vector.load %arg1[%c0_1, %c0_2] : memref<256x128xf32, #tpu.memory_space<vmem>>, vector<256x128xf32>
    %cst = arith.constant dense<0.000000e+00> : vector<8x128xf32>
    %2 = tpu.matmul %0, %1, %cst {dimension_numbers = #tpu.dot_dimension_numbers<[1], [0], [0], [1], [0, 0, 1, 1], [], []>} : vector<8x256xf32>, vector<256x128xf32>, vector<8x128xf32> -> vector<8x128xf32>
    %c0_3 = arith.constant 0 : index
    %c0_4 = arith.constant 0 : index
    %3 = vector.load %arg3[%c0_3, %c0_4] : memref<8x128xf32, #tpu.memory_space<vmem>>, vector<8x128xf32>
    tpu.vector_store %arg3[%c0_3, %c0_4], %2 {strides = array<i32>} : memref<8x128xf32, #tpu.memory_space<vmem>>, vector<8x128xf32>,
    return
  }
  func.func @transform_0(%arg0: i32) -> (i32, i32) {
    %c0_i32 = arith.constant 0 : i32
    %c0_i32_0 = arith.constant 0 : i32
    %c0_i32_1 = arith.constant 0 : i32
    return %c0_i32, %c0_i32_0 : i32, i32
  }
  func.func @transform_1(%arg0: i32) -> (i32, i32) {
    %c0_i32 = arith.constant 0 : i32
    %c0_i32_0 = arith.constant 0 : i32
    return %arg0, %c0_i32 : i32, i32
  }
  func.func @transform_2(%arg0: i32) -> (i32, i32) {
    %c0_i32 = arith.constant 0 : i32
    %c0_i32_0 = arith.constant 0 : i32
    return %arg0, %c0_i32 : i32, i32
  }
}

</mosaic_0001>

<bundles_post_ra>
// kernel: tpu_custom_call.1
= control target key start
LH: loop header
LB: loop body
LE: loop exit
PB: predicated region body
PF: predicated region fallthrough
CT: control target
= control target key end

     0   :  { %7 = vsyncpa [#allocation3], 0  ;;  %s247_s0 = inlined_call_operand.hbm [shape: f32[256,128], index: 0, kind: input, shape index: {}]   ;;  %s248_s1 = inlined_call_operand.hbm [shape: f32[8,256], index: 1, kind: input, shape index: {}]   ;;  %s249_s2 = inlined_call_operand.hbm [shape: f32[8,128], index: 2, kind: output, shape index: {}]  }
   0x1   :  { %8 = vsyncpa [#allocation6], 0 }
   0x2   :  { %9 = vsyncpa [#allocation4], 0  ;;  %s14_s11 = sshll.u32 %s247_s0, 4  ;;  %s218_s12 = smov [#allocation2]   ;;  %s15_s11 = int_to_ptr.hbm [resolvable:$true] %s14_s11 }
   0x3   :  { %s16_s13 = sshll.u32 %s218_s12, 4  ;;  %s28_s16 = sshll.u32 %s248_s1, 4  ;;  %s17_s13 = int_to_ptr.vmem [resolvable:$true] %s16_s13  ;;  %s29_s16 = int_to_ptr.hbm [resolvable:$true] %s28_s16 }
   0x4   :  { %s219_s17 = smov 128   ;;  %s220_s18 = smov 8  }
   0x5   :  { %22 = dma.hbm_to_vmem [thread:$0]  %s15_s11, 4096, %s17_s13, [#allocation3], %s219_s17, %s219_s17, %s220_s18  }
   0x6   :  { %s221_s19 = smov [#allocation5]  }
   0x7   :  { %s30_s20 = sshll.u32 %s221_s19, 4  ;;  %s31_s20 = int_to_ptr.vmem [resolvable:$true] %s30_s20 }
   0x8   :  { %33 = dma.hbm_to_vmem [thread:$0]  %s29_s16, 256, %s31_s20, [#allocation6]  }
   0x9   :  { %212 = dma.done.wait [#allocation3], 4096  }
   0xa   :  { %213 = vsyncadd [#allocation3], 4294963200 }
   0xb   :  { %214 = dma.done.wait [#allocation6], 256  }
   0xc   :  { %215 = vsyncadd [#allocation6], 4294967040  ;;  %v59_v0 = vld [vmem:[#allocation2 + $0x78] sm:$0xff]  ;;  %v58_v2 = vld [vmem:[#allocation2 + $0x70] sm:$0xff]  ;;  %s222_s0 = smov [#allocation7]   ;;  %s124_s23 = sshll.u32 %s249_s2, 4  ;;  %s125_s23 = int_to_ptr.hbm [resolvable:$true] %s124_s23 }
   0xd   :  { %v75_v1 = vld [vmem:[#allocation2 + $0xf8] sm:$0xff]  ;;  %76 = vmatpush.msra.mxu0 %v59_v0  ;;  %v74_v3 = vld [vmem:[#allocation2 + $0xf0] sm:$0xff]  ;;  %v57_v4 = vld [vmem:[#allocation2 + $0x68] sm:$0xff]  ;;  %s122_s1 = sshll.u32 %s222_s0, 4  ;;  %s123_s1 = int_to_ptr.vmem [resolvable:$true] %s122_s1 }
   0xe   :  { %96 = vmatpush.msra.mxu1 %v75_v1  ;;  %v73_v5 = vld [vmem:[#allocation2 + $0xe8] sm:$0xff]  ;;  %v56_v6 = vld [vmem:[#allocation2 + $0x60] sm:$0xff]  ;;  %v55_v8 = vld [vmem:[#allocation2 + $0x58] sm:$0xff] }
   0xf   :  { %77 = vmatpush.msra.mxu0 %v58_v2  ;;  %v72_v7 = vld [vmem:[#allocation2 + $0xe0] sm:$0xff]  ;;  %v71_v9 = vld [vmem:[#allocation2 + $0xd8] sm:$0xff]  ;;  %v54_v10 = vld [vmem:[#allocation2 + $0x50] sm:$0xff] }
  0x10   :  { %97 = vmatpush.msra.mxu1 %v74_v3  ;;  %v70_v11 = vld [vmem:[#allocation2 + $0xd0] sm:$0xff]  ;;  %v53_v12 = vld [vmem:[#allocation2 + $0x48] sm:$0xff]  ;;  %v52_v14 = vld [vmem:[#allocation2 + $0x40] sm:$0xff] }
  0x11   :  { %78 = vmatpush.msra.mxu0 %v57_v4  ;;  %v69_v13 = vld [vmem:[#allocation2 + $0xc8] sm:$0xff]  ;;  %v68_v15 = vld [vmem:[#allocation2 + $0xc0] sm:$0xff]  ;;  %v51_v16 = vld [vmem:[#allocation2 + $0x38] sm:$0xff] }
  0x12   :  { %98 = vmatpush.msra.mxu1 %v73_v5  ;;  %v67_v17 = vld [vmem:[#allocation2 + $0xb8] sm:$0xff]  ;;  %v50_v18 = vld [vmem:[#allocation2 + $0x30] sm:$0xff]  ;;  %v49_v20 = vld [vmem:[#allocation2 + $0x28] sm:$0xff] }
  0x13   :  { %79 = vmatpush.msra.mxu0 %v56_v6  ;;  %v66_v19 = vld [vmem:[#allocation2 + $0xb0] sm:$0xff]  ;;  %v65_v21 = vld [vmem:[#allocation2 + $0xa8] sm:$0xff]  ;;  %v48_v22 = vld [vmem:[#allocation2 + $0x20] sm:$0xff] }
  0x14   :  { %99 = vmatpush.msra.mxu1 %v72_v7  ;;  %v64_v23 = vld [vmem:[#allocation2 + $0xa0] sm:$0xff]  ;;  %v47_v24 = vld [vmem:[#allocation2 + $0x18] sm:$0xff]  ;;  %v46_v26 = vld [vmem:[#allocation2 + $0x10] sm:$0xff] }
  0x15   :  { %80 = vmatpush.msra.mxu0 %v55_v8  ;;  %v63_v25 = vld [vmem:[#allocation2 + $0x98] sm:$0xff]  ;;  %v62_v27 = vld [vmem:[#allocation2 + $0x90] sm:$0xff]  ;;  %v45_v28 = vld [vmem:[#allocation2 + $0x8] sm:$0xff] }
  0x16   :  { %100 = vmatpush.msra.mxu1 %v71_v9  ;;  %v61_v29 = vld [vmem:[#allocation2 + $0x88] sm:$0xff]  ;;  %v44_v30 = vld [vmem:[#allocation2] sm:$0xff] }
  0x17   :  { %81 = vmatpush.msra.mxu0 %v54_v10  ;;  %v60_v31 = vld [vmem:[#allocation2 + $0x80] sm:$0xff]  ;;  %v43_v33 = vld [vmem:[#allocation5 + $0x8] sm:$0xff] }
  0x18   :  { %101 = vmatpush.msra.mxu1 %v70_v11  ;;  %v42_v32 = vld [vmem:[#allocation5] sm:$0xff] }
  0x19   :  { %82 = vmatpush.msra.mxu0 %v53_v12 }
  0x1a   :  { %102 = vmatpush.msra.mxu1 %v69_v13 }
  0x1b   :  { %83 = vmatpush.msra.mxu0 %v52_v14 }
  0x1c   :  { %103 = vmatpush.msra.mxu1 %v68_v15 }
  0x1d   :  { %84 = vmatpush.msra.mxu0 %v51_v16 }
  0x1e   :  { %104 = vmatpush.msra.mxu1 %v67_v17 }
  0x1f   :  { %85 = vmatpush.msra.mxu0 %v50_v18 }
  0x20   :  { %105 = vmatpush.msra.mxu1 %v66_v19 }
  0x21   :  { %86 = vmatpush.msra.mxu0 %v49_v20 }
  0x22   :  { %106 = vmatpush.msra.mxu1 %v65_v21 }
  0x23   :  { %87 = vmatpush.msra.mxu0 %v48_v22 }
  0x24   :  { %107 = vmatpush.msra.mxu1 %v64_v23 }
  0x25   :  { %88 = vmatpush.msra.mxu0 %v47_v24 }
  0x26   :  { %108 = vmatpush.msra.mxu1 %v63_v25 }
  0x27   :  { %89 = vmatpush.msra.mxu0 %v46_v26 }
  0x28   :  { %109 = vmatpush.msra.mxu1 %v62_v27 }
  0x29   :  { %90 = vmatpush.msra.mxu0 %v45_v28 }
  0x2a   :  { %110 = vmatpush.msra.mxu1 %v61_v29 }
  0x2b   :  { %91 = vmatpush.msra.mxu0 %v44_v30 }
  0x2c   :  { %111 = vmatpush.msra.mxu1 %v60_v31  ;;  %92 = vmatmul.f32.vlgmr.msra.gmra.mxu0 %v42_v32 }
  0x2d   :  { %112 = vmatmul.f32.vlgmr.msra.gmra.mxu1 %v43_v33 }
  0xa9   :  { %v93_v34 = vpop.f32.mrf.mxu0 }
  0xaa   :  { %v113_v35 = vpop.f32.mrf.mxu1 }
  0xab   :  { %v114_v36 = vadd.f32 %v113_v35, %v93_v34 }
  0xad   :  { %116 = vst [vmem:[#allocation7] sm:$0xff] %v114_v36 }
  0xae   :  { %127 = dma.vmem_to_hbm [thread:$0]  %s123_s1, 128, %s125_s23, [#allocation4]  }
  0xaf   :  { %216 = dma.done.wait [#allocation4], 128  }
  0xb0   :  { %217 = vsyncadd [#allocation4], 4294967168 }
  0xb1   :  { %132 = vsyncpa [#allocation3], 1 }
  0xb2   :  { %133 = vsyncpa [#allocation6], 1 }
  0xb3   :  { %134 = vsyncpa [#allocation4], 1 }

</bundles_post_ra>
